<compile_context>
chip_gen: v5e
topology: v5e:2x2
jax: 0.10.0
libtpu: 0.0.40
codegen_flags: <defaults>
</compile_context>

<pallas_src>
import functools

import jax
import jax.numpy as jnp
from jax.experimental import pallas as pl
from jax.experimental.pallas import tpu as pltpu

EPS = 1e-5          # ScaleNorm eps (torch: norm.clamp(min=eps))
LANE = 128
MAX_TB = 2048       # max batch-tile rows (fits v5e's 16 MiB scoped-VMEM default)
SPLIT_TB = 1024     # batches >= this get >= 2 grid steps (v7x 2-TC sharding)


def _round_up(x, m):
    return (x + m - 1) // m * m


def _choose_tiling(batch):
    """Pick (tile_rows, padded_batch, n_steps) — all static Python ints."""
    b16 = _round_up(batch, 16)            # bf16 sublane pack; <=15 wasted rows
    if b16 < SPLIT_TB:
        n_steps = 1
    elif b16 <= MAX_TB:
        n_steps = 2                       # keep both v7x TensorCores busy
    else:
        n_steps = _round_up(pl.cdiv(b16, MAX_TB), 2)
    tb = _round_up(pl.cdiv(b16, n_steps), 16)
    return tb, tb * n_steps, n_steps


# ---------------------------------------------------------------------------
# Fused Pallas kernel: all ff blocks + final Linear on one batch tile
# ---------------------------------------------------------------------------
def _nn_encoder_kernel(n_rest, w1_ref, wr_ref, b_ref, g_ref, ow_ref, ob_ref,
                       x_ref, o_ref):
    """One batch tile through the whole network (eval-mode forward).

    w1_ref: (F, P)             bf16  first-layer weight (unpadded rows)
    wr_ref: (max(1,L-1), P, P) bf16  remaining hidden->hidden weights
    b_ref : (L, 1, P)          f32   biases (padded lanes are exactly zero)
    g_ref : (L,)               f32   ScaleNorm gains (SMEM scalars)
    ow_ref: (P, C)             bf16  output weight
    ob_ref: (1, C)             f32   output bias
    x_ref : (TB, F)            bf16  batch tile (narrow, never lane-padded)
    o_ref : (TB, C)            f32   narrow output tile
    """

    def block(z, layer):
        z = z + b_ref[layer]                               # bias, f32
        z = z * jax.nn.sigmoid(z)                          # Swish (VPU + EUP)
        # ScaleNorm: z * g / max(||z||, eps) == z * g * rsqrt(max(||z||^2, eps^2))
        ss = jnp.sum(z * z, axis=-1, keepdims=True)
        scale = g_ref[layer] * jax.lax.rsqrt(jnp.maximum(ss, EPS * EPS))
        # TODO(synk): nn.AlphaDropout is identity in eval mode; training-time
        # SELU-preserving noise is not implemented here.
        return (z * scale).astype(jnp.bfloat16)

    # Layer 0: narrow-K matmul against the unpadded (F, P) weight.
    h = block(jnp.dot(x_ref[...], w1_ref[...],
                      preferred_element_type=jnp.float32), 0)
    for l in range(n_rest):                                # static unroll (small L)
        h = block(jnp.dot(h, wr_ref[l],
                          preferred_element_type=jnp.float32), l + 1)

    out = jnp.dot(h, ow_ref[...], preferred_element_type=jnp.float32) + ob_ref[...]
    o_ref[...] = out.astype(o_ref.dtype)


# ---------------------------------------------------------------------------
# Wrapper
# ---------------------------------------------------------------------------
@jax.jit
def nn_encoder_forward(packed, x):
    w1, wr = packed["w1"], packed["w_rest"]
    b, g = packed["b"], packed["g"]
    ow, ob = packed["out_w"], packed["out_b"]

    n_layers = b.shape[0]
    n_rest = n_layers - 1
    F, P = w1.shape
    C = ow.shape[1]
    batch = x.shape[0]
    assert x.shape[1] == F

    tb, b_pad, n_steps = _choose_tiling(batch)
    x_b = x.astype(jnp.bfloat16)                 # bf16 DMA: half the read bytes
    if b_pad != batch:
        x_b = jnp.pad(x_b, ((0, b_pad - batch), (0, 0)))

    out = pl.pallas_call(
        functools.partial(_nn_encoder_kernel, n_rest),
        out_shape=jax.ShapeDtypeStruct((b_pad, C), jnp.float32),
        grid=(n_steps,),
        in_specs=[
            # Grid-invariant operands: constant index_maps -> DMA'd once and
            # VMEM-resident across all batch tiles.
            pl.BlockSpec((F, P), lambda i: (0, 0)),             # layer-0 weight
            pl.BlockSpec(wr.shape, lambda i: (0, 0, 0)),        # remaining weights
            pl.BlockSpec(b.shape, lambda i: (0, 0, 0)),         # biases
            pl.BlockSpec(memory_space=pltpu.SMEM),              # gains (SMEM)
            pl.BlockSpec((P, C), lambda i: (0, 0)),             # out weight
            pl.BlockSpec((1, C), lambda i: (0, 0)),             # out bias
            # Activation: batch-tiled, narrow (unpadded) lanes, bf16.
            pl.BlockSpec((tb, F), lambda i: (i, 0)),
        ],
        # Narrow output block (last dim == full array dim): masked stores but
        # 32x fewer HBM write bytes than a 128-lane padded f32 slab, and no
        # wrapper-side slice read-back.
        out_specs=pl.BlockSpec((tb, C), lambda i: (i, 0)),
        compiler_params=pltpu.CompilerParams(
            dimension_semantics=("parallel",),                  # 2-TC shard on v7x
        ),
    )(w1, wr, b, g, ow, ob, x_b)

    return out[:batch] if b_pad != batch else out


# ---------------------------------------------------------------------------
# Parameter init (deterministic, PyTorch nn.Linear-style uniform)
# Returns both the fp32 "torch" params and the packed/padded kernel params.
# ---------------------------------------------------------------------------
def _init_linear(key, fan_in, fan_out):
    k_w, k_b = jax.random.split(key)
    bound = 1.0 / (fan_in ** 0.5)
    # stored PyTorch-style (out, in); transposed so the hot path is x @ W
    w = jax.random.uniform(k_w, (fan_out, fan_in), jnp.float32, -bound, bound)
    b = jax.random.uniform(k_b, (fan_out,), jnp.float32, -bound, bound)
    return w.T, b


def init_nn_encoder(key, input_size, hidden_size, n_layers, cls_num_targets):
    keys = jax.random.split(key, n_layers + 1)

    ff_w, ff_b, ff_g = [], [], []
    d_in = input_size
    for l in range(n_layers):
        w, b = _init_linear(keys[l], d_in, hidden_size)
        ff_w.append(w)
        ff_b.append(b)
        ff_g.append(float(hidden_size) ** 0.5)
        d_in = hidden_size
    ow, ob = _init_linear(keys[-1], hidden_size, cls_num_targets)
    fp32 = {"ff_w": ff_w, "ff_b": ff_b, "ff_g": ff_g, "out_w": ow, "out_b": ob}

    # Pack / pad for the kernel.  Padded lanes MUST be exactly zero so they do
    # not leak into ScaleNorm's sum of squares.
    P = _round_up(hidden_size, LANE)

    def pad_hh(w):  # (hidden, hidden) -> (P, P)
        return jnp.pad(w, ((0, P - w.shape[0]), (0, P - w.shape[1])))

    w1 = jnp.pad(ff_w[0], ((0, 0), (0, P - hidden_size)))            # (F, P)
    if n_layers > 1:
        w_rest = jnp.stack([pad_hh(w) for w in ff_w[1:]])            # (L-1, P, P)
    else:
        w_rest = jnp.zeros((1, P, P), jnp.float32)                   # unused dummy
    b_pack = jnp.stack(
        [jnp.pad(b, (0, P - hidden_size))[None, :] for b in ff_b])   # (L, 1, P)

    packed = {
        "w1": w1.astype(jnp.bfloat16),
        "w_rest": w_rest.astype(jnp.bfloat16),
        "b": b_pack.astype(jnp.float32),
        "g": jnp.asarray(ff_g, jnp.float32),                         # (L,)
        "out_w": jnp.pad(ow, ((0, P - hidden_size), (0, 0))).astype(jnp.bfloat16),
        "out_b": ob[None, :].astype(jnp.float32),                    # (1, C)
    }
    return fp32, packed


# ---------------------------------------------------------------------------
# Pure-fp32 reference of the PyTorch forward (eval mode)
# ---------------------------------------------------------------------------
def ref_forward(p, x):
    h = x
    for w, b, g in zip(p["ff_w"], p["ff_b"], p["ff_g"]):
        z = h @ w + b
        z = z * jax.nn.sigmoid(z)                                    # Swish
        norm = jnp.maximum(jnp.linalg.norm(z, axis=-1, keepdims=True), EPS)
        h = z * (g / norm)                                           # ScaleNorm
        # AlphaDropout: identity in eval mode.
    return h @ p["out_w"] + p["out_b"]


# ---------------------------------------------------------------------------
if __name__ == "__main__":
    # hparams: input_size=16, hidden_size=32, n_layers=3, cls_num_targets=4
    INPUT_SIZE, HIDDEN_SIZE, N_LAYERS, CLS = 16, 32, 3, 4

    key = jax.random.PRNGKey(0)
    k_params, k_x1, k_x2 = jax.random.split(key, 3)
    fp32, packed = init_nn_encoder(k_params, INPUT_SIZE, HIDDEN_SIZE, N_LAYERS, CLS)

    # small batch (single grid step) and a large, non-multiple-of-16 batch
    # (batch padding + 2-step "parallel" grid path).
    for name, B, kx in (("small", 8, k_x1), ("multi_step", 1500, k_x2)):
        x = jax.random.normal(kx, (B, INPUT_SIZE), jnp.float32)
        out = nn_encoder_forward(packed, x)
        jax.block_until_ready(out)

        ref = ref_forward(fp32, x)
        assert out.shape == (B, CLS), (name, out.shape)
        err = float(jnp.max(jnp.abs(out - ref)))
        # bf16 weights/activations vs fp32 math -> small quantization error
        assert err < 5e-2, (name, err)

    print("KERNEL_OK")
</pallas_src>

<mosaic_0001>
module attributes {stable_mosaic.version = 11 : i64} {
  func.func @_nn_encoder_kernel(%arg0: i32, %arg1: memref<16x128xbf16, #tpu.memory_space<vmem>>, %arg2: memref<2x128x128xbf16, #tpu.memory_space<vmem>>, %arg3: memref<3x1x128xf32, #tpu.memory_space<vmem>>, %arg4: memref<3xf32, #tpu.memory_space<smem>>, %arg5: memref<128x4xbf16, #tpu.memory_space<vmem>>, %arg6: memref<1x4xf32, #tpu.memory_space<vmem>>, %arg7: memref<16x16xbf16, #tpu.memory_space<vmem>>, %arg8: memref<16x4xf32, #tpu.memory_space<vmem>>) attributes {dimension_semantics = [#tpu.dimension_semantics<parallel>], iteration_bounds = array<i64: 1>, scalar_prefetch = 0 : i64, scratch_operands = 0 : i64, tpu.core_type = #tpu.core_type<tc>, window_params = [{pipeline_mode = #tpu.pipeline_mode<synchronous>, transform_indices = @transform_0, window_bounds = array<i64: 16, 128>}, {pipeline_mode = #tpu.pipeline_mode<synchronous>, transform_indices = @transform_1, window_bounds = array<i64: 2, 128, 128>}, {pipeline_mode = #tpu.pipeline_mode<synchronous>, transform_indices = @transform_2, window_bounds = array<i64: 3, 1, 128>}, {transform_indices = @transform_3, window_bounds = array<i64: 3>}, {pipeline_mode = #tpu.pipeline_mode<synchronous>, transform_indices = @transform_4, window_bounds = array<i64: 128, 4>}, {pipeline_mode = #tpu.pipeline_mode<synchronous>, transform_indices = @transform_5, window_bounds = array<i64: 1, 4>}, {transform_indices = @transform_6, window_bounds = array<i64: 16, 16>}, {transform_indices = @transform_7, window_bounds = array<i64: 16, 4>}]} {
    %c0 = arith.constant 0 : index
    %c0_0 = arith.constant 0 : index
    %0 = vector.load %arg7[%c0, %c0_0] : memref<16x16xbf16, #tpu.memory_space<vmem>>, vector<16x16xbf16>
    %c0_1 = arith.constant 0 : index
    %c0_2 = arith.constant 0 : index
    %1 = vector.load %arg1[%c0_1, %c0_2] : memref<16x128xbf16, #tpu.memory_space<vmem>>, vector<16x128xbf16>
    %cst = arith.constant dense<0.000000e+00> : vector<16x128xf32>
    %2 = tpu.matmul %0, %1, %cst {dimension_numbers = #tpu.dot_dimension_numbers<[1], [0], [0], [1], [0, 0, 1, 1], [], []>} : vector<16x16xbf16>, vector<16x128xbf16>, vector<16x128xf32> -> vector<16x128xf32>
    %c0_3 = arith.constant 0 : index
    %c0_4 = arith.constant 0 : index
    %c0_5 = arith.constant 0 : index
    %3 = vector.load %arg3[%c0_3, %c0_4, %c0_5] : memref<3x1x128xf32, #tpu.memory_space<vmem>>, vector<1x1x128xf32>
    %4 = vector.shape_cast %3 : vector<1x1x128xf32> to vector<1x128xf32>
    %5 = vector.broadcast %4 : vector<1x128xf32> to vector<16x128xf32>
    %6 = arith.addf %2, %5 : vector<16x128xf32>
    %7 = arith.negf %6 : vector<16x128xf32>
    %8 = math.exp %7 : vector<16x128xf32>
    %cst_6 = arith.constant 1.000000e+00 : f32
    %9 = vector.broadcast %cst_6 : f32 to vector<16x128xf32>
    %10 = arith.addf %9, %8 : vector<16x128xf32>
    %11 = arith.divf %9, %10 : vector<16x128xf32>
    %12 = arith.mulf %6, %11 : vector<16x128xf32>
    %13 = arith.mulf %12, %12 : vector<16x128xf32>
    %cst_7 = arith.constant dense<0.000000e+00> : vector<16xf32>
    %14 = vector.multi_reduction <add>, %13, %cst_7 [1] : vector<16x128xf32> to vector<16xf32>
    %15 = vector.shape_cast %14 : vector<16xf32> to vector<16x1xf32>
    %c0_8 = arith.constant 0 : index
    %16 = memref.load %arg4[%c0_8] : memref<3xf32, #tpu.memory_space<smem>>
    %cst_9 = arith.constant 1.000000e-10 : f32
    %17 = vector.broadcast %cst_9 : f32 to vector<16x1xf32>
    %18 = arith.maximumf %15, %17 : vector<16x1xf32>
    %19 = math.rsqrt %18 : vector<16x1xf32>
    %20 = vector.broadcast %16 : f32 to vector<16x1xf32>
    %21 = arith.mulf %20, %19 : vector<16x1xf32>
    %22 = vector.broadcast %21 : vector<16x1xf32> to vector<16x128xf32>
    %23 = arith.mulf %12, %22 : vector<16x128xf32>
    %24 = arith.truncf %23 : vector<16x128xf32> to vector<16x128xbf16>
    %c0_10 = arith.constant 0 : index
    %c0_11 = arith.constant 0 : index
    %c0_12 = arith.constant 0 : index
    %25 = vector.load %arg2[%c0_10, %c0_11, %c0_12] : memref<2x128x128xbf16, #tpu.memory_space<vmem>>, vector<1x128x128xbf16>
    %26 = vector.shape_cast %25 : vector<1x128x128xbf16> to vector<128x128xbf16>
    %cst_13 = arith.constant dense<0.000000e+00> : vector<16x128xf32>
    %27 = tpu.matmul %24, %26, %cst_13 {dimension_numbers = #tpu.dot_dimension_numbers<[1], [0], [0], [1], [0, 0, 1, 1], [], []>} : vector<16x128xbf16>, vector<128x128xbf16>, vector<16x128xf32> -> vector<16x128xf32>
    %c1 = arith.constant 1 : index
    %c0_14 = arith.constant 0 : index
    %c0_15 = arith.constant 0 : index
    %28 = vector.load %arg3[%c1, %c0_14, %c0_15] : memref<3x1x128xf32, #tpu.memory_space<vmem>>, vector<1x1x128xf32>
    %29 = vector.shape_cast %28 : vector<1x1x128xf32> to vector<1x128xf32>
    %30 = vector.broadcast %29 : vector<1x128xf32> to vector<16x128xf32>
    %31 = arith.addf %27, %30 : vector<16x128xf32>
    %32 = arith.negf %31 : vector<16x128xf32>
    %33 = math.exp %32 : vector<16x128xf32>
    %cst_16 = arith.constant 1.000000e+00 : f32
    %34 = vector.broadcast %cst_16 : f32 to vector<16x128xf32>
    %35 = arith.addf %34, %33 : vector<16x128xf32>
    %36 = arith.divf %34, %35 : vector<16x128xf32>
    %37 = arith.mulf %31, %36 : vector<16x128xf32>
    %38 = arith.mulf %37, %37 : vector<16x128xf32>
    %cst_17 = arith.constant dense<0.000000e+00> : vector<16xf32>
    %39 = vector.multi_reduction <add>, %38, %cst_17 [1] : vector<16x128xf32> to vector<16xf32>
    %40 = vector.shape_cast %39 : vector<16xf32> to vector<16x1xf32>
    %c1_18 = arith.constant 1 : index
    %41 = memref.load %arg4[%c1_18] : memref<3xf32, #tpu.memory_space<smem>>
    %cst_19 = arith.constant 1.000000e-10 : f32
    %42 = vector.broadcast %cst_19 : f32 to vector<16x1xf32>
    %43 = arith.maximumf %40, %42 : vector<16x1xf32>
    %44 = math.rsqrt %43 : vector<16x1xf32>
    %45 = vector.broadcast %41 : f32 to vector<16x1xf32>
    %46 = arith.mulf %45, %44 : vector<16x1xf32>
    %47 = vector.broadcast %46 : vector<16x1xf32> to vector<16x128xf32>
    %48 = arith.mulf %37, %47 : vector<16x128xf32>
    %49 = arith.truncf %48 : vector<16x128xf32> to vector<16x128xbf16>
    %c1_20 = arith.constant 1 : index
    %c0_21 = arith.constant 0 : index
    %c0_22 = arith.constant 0 : index
    %50 = vector.load %arg2[%c1_20, %c0_21, %c0_22] : memref<2x128x128xbf16, #tpu.memory_space<vmem>>, vector<1x128x128xbf16>
    %51 = vector.shape_cast %50 : vector<1x128x128xbf16> to vector<128x128xbf16>
    %cst_23 = arith.constant dense<0.000000e+00> : vector<16x128xf32>
    %52 = tpu.matmul %49, %51, %cst_23 {dimension_numbers = #tpu.dot_dimension_numbers<[1], [0], [0], [1], [0, 0, 1, 1], [], []>} : vector<16x128xbf16>, vector<128x128xbf16>, vector<16x128xf32> -> vector<16x128xf32>
    %c2 = arith.constant 2 : index
    %c0_24 = arith.constant 0 : index
    %c0_25 = arith.constant 0 : index
    %53 = vector.load %arg3[%c2, %c0_24, %c0_25] : memref<3x1x128xf32, #tpu.memory_space<vmem>>, vector<1x1x128xf32>
    %54 = vector.shape_cast %53 : vector<1x1x128xf32> to vector<1x128xf32>
    %55 = vector.broadcast %54 : vector<1x128xf32> to vector<16x128xf32>
    %56 = arith.addf %52, %55 : vector<16x128xf32>
    %57 = arith.negf %56 : vector<16x128xf32>
    %58 = math.exp %57 : vector<16x128xf32>
    %cst_26 = arith.constant 1.000000e+00 : f32
    %59 = vector.broadcast %cst_26 : f32 to vector<16x128xf32>
    %60 = arith.addf %59, %58 : vector<16x128xf32>
    %61 = arith.divf %59, %60 : vector<16x128xf32>
    %62 = arith.mulf %56, %61 : vector<16x128xf32>
    %63 = arith.mulf %62, %62 : vector<16x128xf32>
    %cst_27 = arith.constant dense<0.000000e+00> : vector<16xf32>
    %64 = vector.multi_reduction <add>, %63, %cst_27 [1] : vector<16x128xf32> to vector<16xf32>
    %65 = vector.shape_cast %64 : vector<16xf32> to vector<16x1xf32>
    %c2_28 = arith.constant 2 : index
    %66 = memref.load %arg4[%c2_28] : memref<3xf32, #tpu.memory_space<smem>>
    %cst_29 = arith.constant 1.000000e-10 : f32
    %67 = vector.broadcast %cst_29 : f32 to vector<16x1xf32>
    %68 = arith.maximumf %65, %67 : vector<16x1xf32>
    %69 = math.rsqrt %68 : vector<16x1xf32>
    %70 = vector.broadcast %66 : f32 to vector<16x1xf32>
    %71 = arith.mulf %70, %69 : vector<16x1xf32>
    %72 = vector.broadcast %71 : vector<16x1xf32> to vector<16x128xf32>
    %73 = arith.mulf %62, %72 : vector<16x128xf32>
    %74 = arith.truncf %73 : vector<16x128xf32> to vector<16x128xbf16>
    %c0_30 = arith.constant 0 : index
    %c0_31 = arith.constant 0 : index
    %75 = vector.load %arg5[%c0_30, %c0_31] : memref<128x4xbf16, #tpu.memory_space<vmem>>, vector<128x4xbf16>
    %cst_32 = arith.constant dense<0.000000e+00> : vector<16x4xf32>
    %76 = tpu.matmul %74, %75, %cst_32 {dimension_numbers = #tpu.dot_dimension_numbers<[1], [0], [0], [1], [0, 0, 1, 1], [], []>} : vector<16x128xbf16>, vector<128x4xbf16>, vector<16x4xf32> -> vector<16x4xf32>
    %c0_33 = arith.constant 0 : index
    %c0_34 = arith.constant 0 : index
    %77 = vector.load %arg6[%c0_33, %c0_34] : memref<1x4xf32, #tpu.memory_space<vmem>>, vector<1x4xf32>
    %78 = vector.broadcast %77 : vector<1x4xf32> to vector<16x4xf32>
    %79 = arith.addf %76, %78 : vector<16x4xf32>
    %c0_35 = arith.constant 0 : index
    %c0_36 = arith.constant 0 : index
    %80 = vector.load %arg8[%c0_35, %c0_36] : memref<16x4xf32, #tpu.memory_space<vmem>>, vector<16x4xf32>
    tpu.vector_store %arg8[%c0_35, %c0_36], %79 {strides = array<i32>} : memref<16x4xf32, #tpu.memory_space<vmem>>, vector<16x4xf32>,
    return
  }
  func.func @transform_0(%arg0: i32) -> (i32, i32) {
    %c0_i32 = arith.constant 0 : i32
    %c0_i32_0 = arith.constant 0 : i32
    %c0_i32_1 = arith.constant 0 : i32
    return %c0_i32, %c0_i32_0 : i32, i32
  }
  func.func @transform_1(%arg0: i32) -> (i32, i32, i32) {
    %c0_i32 = arith.constant 0 : i32
    %c0_i32_0 = arith.constant 0 : i32
    %c0_i32_1 = arith.constant 0 : i32
    %c0_i32_2 = arith.constant 0 : i32
    return %c0_i32, %c0_i32_0, %c0_i32_1 : i32, i32, i32
  }
  func.func @transform_2(%arg0: i32) -> (i32, i32, i32) {
    %c0_i32 = arith.constant 0 : i32
    %c0_i32_0 = arith.constant 0 : i32
    %c0_i32_1 = arith.constant 0 : i32
    %c0_i32_2 = arith.constant 0 : i32
    return %c0_i32, %c0_i32_0, %c0_i32_1 : i32, i32, i32
  }
  func.func @transform_3(%arg0: i32) -> i32 {
    %c0_i32 = arith.constant 0 : i32
    %c0_i32_0 = arith.constant 0 : i32
    return %c0_i32 : i32
  }
  func.func @transform_4(%arg0: i32) -> (i32, i32) {
    %c0_i32 = arith.constant 0 : i32
    %c0_i32_0 = arith.constant 0 : i32
    %c0_i32_1 = arith.constant 0 : i32
    return %c0_i32, %c0_i32_0 : i32, i32
  }
  func.func @transform_5(%arg0: i32) -> (i32, i32) {
    %c0_i32 = arith.constant 0 : i32
    %c0_i32_0 = arith.constant 0 : i32
    %c0_i32_1 = arith.constant 0 : i32
    return %c0_i32, %c0_i32_0 : i32, i32
  }
  func.func @transform_6(%arg0: i32) -> (i32, i32) {
    %c0_i32 = arith.constant 0 : i32
    %c0_i32_0 = arith.constant 0 : i32
    return %arg0, %c0_i32 : i32, i32
  }
  func.func @transform_7(%arg0: i32) -> (i32, i32) {
    %c0_i32 = arith.constant 0 : i32
    %c0_i32_0 = arith.constant 0 : i32
    return %arg0, %c0_i32 : i32, i32
  }
}

</mosaic_0001>

<bundles_post_ra>
// kernel: nn_encoder_forward.1
= control target key start
LH: loop header
LB: loop body
LE: loop exit
PB: predicated region body
PF: predicated region fallthrough
CT: control target
= control target key end

     0   :  { %12 = vsyncpa [#allocation3], 0  ;;  %s914_s0 = inlined_call_operand.vmem [shape: bf16[16,128], index: 0, kind: input, shape index: {}]   ;;  %s915_s1 = inlined_call_operand.hbm [shape: bf16[2,128,128], index: 1, kind: input, shape index: {}]   ;;  %s916_s2 = inlined_call_operand.vmem [shape: f32[3,1,128], index: 2, kind: input, shape index: {}]   ;;  %s917_s3 = inlined_call_operand.vmem [shape: f32[3], index: 3, kind: input, shape index: {}]   ;;  %s918_s4 = inlined_call_operand.vmem [shape: bf16[128,4], index: 4, kind: input, shape index: {}]   ;;  %s919_s5 = inlined_call_operand.vmem [shape: f32[1,4], index: 5, kind: input, shape index: {}]   ;;  %s920_s6 = inlined_call_operand.vmem [shape: bf16[16,16], index: 6, kind: input, shape index: {}]   ;;  %s921_s7 = inlined_call_operand.vmem [shape: f32[16,4], index: 7, kind: output, shape index: {}]  }
   0x1   :  { %s20_s26 = sshll.u32 %s915_s1, 4  ;;  %s21_s26 = int_to_ptr.hbm [resolvable:$true] %s20_s26 }
   0x2   :  { %13 = vsyncpa [#allocation4], 0  ;;  %s801_s27 = smov [#allocation2]   ;;  %s36_s8 = sshll.u32 %s917_s3, 4  ;;  %s37_s8 = int_to_ptr.vmem [resolvable:$true] %s36_s8 }
   0x3   :  { %s22_s28 = sshll.u32 %s801_s27, 4  ;;  %s802_s9 = smov 64   ;;  %s23_s28 = int_to_ptr.vmem [resolvable:$true] %s22_s28 }
   0x4   :  { %s803_s10 = smov 4   ;;  %s804_s11 = smov [#allocation5]  }
   0x5   :  { %28 = dma.hbm_to_vmem [thread:$0]  %s21_s26, 2048, %s23_s28, [#allocation3], %s802_s9, %s802_s9, %s803_s10  }
   0x6   :  { %39 = dma.vmem_to_smem %s37_s8, 16, %s804_s11, [#allocation4]  }
   0x7   :  { %797 = dma.done.wait [#allocation3], 2048  }
   0x8   :  { %798 = vsyncadd [#allocation3], 4294965248 }
   0x9   :  { %799 = dma.done.wait [#allocation4], 16  }
   0xa   :  { %800 = vsyncadd [#allocation4], 4294967280 }
   0xb   :  { %54 = sfence }
   0xc   :  { %v692_v0 = vld [vmem:[%s914_s0] sm:$0xff]  ;;  %vm75_vm0 = vcmask 130048   ;;  %v700_v37 = vld [vmem:[#allocation2 + $0x38] sm:$0xff]  ;;  %v699_v38 = vld [vmem:[#allocation2 + $0x30] sm:$0xff]  ;;  %s139_s0 = sld [smem:[#allocation5]] }
   0xd   :  { %v691_v1 = vld [vmem:[%s920_s6] sm:$0xff]  ;;  %86 = vmatpush.bf16.msra.mxu0 %v692_v0  ;;  %237 = vmatpush.bf16.msra.mxu1 %v700_v37  ;;  %v698_v39 = vld [vmem:[#allocation2 + $0x28] sm:$0xff]  ;;  %v696_v41 = vld [vmem:[#allocation2 + $0x18] sm:$0xff]  ;;  %s622_s17 = sld [smem:[#allocation5 + $0x1]] }
   0xe   :  { %v721_v2 = vld [vmem:[%s916_s2] ss:$0 sm:$0xff]  ;;  %v695_v42 = vld [vmem:[#allocation2 + $0x10] sm:$0xff]  ;;  %v694_v43 = vld [vmem:[#allocation2 + $0x8] sm:$0xff]  ;;  %s658_s1 = sld [smem:[#allocation5 + $0x2]] }
   0xf   :  { %v697_v40 = vld [vmem:[#allocation2 + $0x20] sm:$0xff] }
  0x10   :  { %584 = vmatmul.msk.bf16.vlgmr.msra.gmra.mxu0 %vm75_vm0, %v691_v1  ;;  %v693_v44 = vld [vmem:[#allocation2] sm:$0xff] }
  0x11   :  { %238 = vmatpush.bf16.msra.mxu1 %v699_v38 }
  0x12   :  { %v162_v61 = vstv %s139_s0 }
  0x15   :  { %239 = vmatpush.bf16.msra.mxu1 %v698_v39 }
  0x19   :  { %240 = vmatpush.bf16.msra.mxu1 %v697_v40  ;;  %v708_v40 = vld [vmem:[#allocation2 + $0x78] sm:$0xff] }
  0x1a   :  { %396 = vmatpush.bf16.msra.mxu2 %v708_v40 }
  0x1d   :  { %241 = vmatpush.bf16.msra.mxu1 %v696_v41  ;;  %v707_v41 = vld [vmem:[#allocation2 + $0x70] sm:$0xff] }
  0x1e   :  { %397 = vmatpush.bf16.msra.mxu2 %v707_v41 }
  0x21   :  { %242 = vmatpush.bf16.msra.mxu1 %v695_v42  ;;  %v706_v42 = vld [vmem:[#allocation2 + $0x68] sm:$0xff] }
  0x22   :  { %398 = vmatpush.bf16.msra.mxu2 %v706_v42 }
  0x25   :  { %243 = vmatpush.bf16.msra.mxu1 %v694_v43  ;;  %v705_v43 = vld [vmem:[#allocation2 + $0x60] sm:$0xff] }
  0x26   :  { %399 = vmatpush.bf16.msra.mxu2 %v705_v43  ;;  %v716_v43 = vld [vmem:[%s918_s4 + $0x38] sm:$0xff] }
  0x27   :  { %553 = vmatpush.bf16.msra.mxu3 %v716_v43 }
  0x29   :  { %244 = vmatpush.bf16.msra.mxu1 %v693_v44  ;;  %v704_v44 = vld [vmem:[#allocation2 + $0x58] sm:$0xff] }
  0x2a   :  { %400 = vmatpush.bf16.msra.mxu2 %v704_v44  ;;  %v715_v44 = vld [vmem:[%s918_s4 + $0x30] sm:$0xff] }
  0x2b   :  { %554 = vmatpush.bf16.msra.mxu3 %v715_v44 }
  0x8d   :  { %v88_v3 = vpop.f32.mrf.mxu0 }
  0x8e   :  { %v89_v4 = vadd.f32 %v721_v2, %v88_v3 }
  0x90   :  { %v585_v5 = vmul.f32 -1.442695, %v89_v4 }
  0x92   :  { %725 = vpow2.f32 %v585_v5  ;;  %v722_v5 = vld [vmem:[%s916_s2 + $0x1] ss:$0 sm:$0xff] }
  0x95   :  { %v90_v6 = vpop.f32.mrf.mxu0 }
  0x96   :  { %v91_v7 = vadd.f32 %v721_v2, %v90_v6 }
  0x98   :  { %v726_v8 = vpop.eup %725  ;;  %v586_v9 = vmul.f32 -1.442695, %v91_v7 }
  0x99   :  { %v99_v10 = vadd.f32 1.0, %v726_v8 }
  0x9a   :  { %727 = vpow2.f32 %v586_v9 }
  0x9b   :  { %729 = vrcp.f32 %v99_v10  ;;  %v112_v16 = vand.u32 2147483648, %v99_v10  ;;  %v110_v18 = vand.u32 2147483647, %v99_v10  ;;  %vm106_vm2 = vweird.f32 %v99_v10 }
  0x9d   :  { %v113_v21 = vor.u32 1.1754944e-38, %v112_v16  ;;  %vm111_vm4 = vcmp.eq.f32.partialorder %v110_v18, 8.507059e+37 }
  0xa0   :  { %v728_v11 = vpop.eup %727 }
  0xa1   :  { %v730_v12 = vpop.eup %729  ;;  %v100_v13 = vadd.f32 1.0, %v728_v11 }
  0xa2   :  { %v102_v14 = vmul.f32 %v730_v12, %v99_v10  ;;  %vm107_vm1 = vweird.f32 %v730_v12 }
  0xa3   :  { %731 = vrcp.f32 %v100_v13  ;;  %vm108_vm3 = vmor %vm106_vm2, %vm107_vm1  ;;  %v127_v27 = vand.u32 2147483648, %v100_v13  ;;  %v125_v29 = vand.u32 2147483647, %v100_v13  ;;  %vm121_vm6 = vweird.f32 %v100_v13 }
  0xa4   :  { %v103_v15 = vsub.f32 1.0, %v102_v14 }
  0xa5   :  { %v128_v32 = vor.u32 1.1754944e-38, %v127_v27  ;;  %vm126_vm8 = vcmp.eq.f32.partialorder %v125_v29, 8.507059e+37 }
  0xa6   :  { %v104_v17 = vmul.f32 %v730_v12, %v103_v15 }
  0xa8   :  { %v105_v19 = vadd.f32 %v730_v12, %v104_v17 }
  0xa9   :  { %v732_v20 = vpop.eup %731 }
  0xaa   :  { %v117_v22 = vmul.f32 %v732_v20, %v100_v13  ;;  %v109_v23 = vsel %vm108_vm3, %v730_v12, %v105_v19  ;;  %vm122_vm5 = vweird.f32 %v732_v20 }
  0xab   :  { %v114_v24 = vsel %vm111_vm4, %v113_v21, %v109_v23  ;;  %vm123_vm7 = vmor %vm121_vm6, %vm122_vm5 }
  0xac   :  { %v118_v25 = vsub.f32 1.0, %v117_v22  ;;  %v860_v26 = vmul.f32 %v114_v24, %v89_v4 }
  0xae   :  { %v119_v28 = vmul.f32 %v732_v20, %v118_v25  ;;  %v133_v30 = vmul.f32 %v860_v26, %v860_v26 }
  0xb0   :  { %v120_v31 = vadd.f32 %v732_v20, %v119_v28  ;;  %135 = vadd.xlane.f32.xlu0 %v133_v30 }
  0xb2   :  { %v124_v33 = vsel %vm123_vm7, %v732_v20, %v120_v31 }
  0xb3   :  { %v129_v34 = vsel %vm126_vm8, %v128_v32, %v124_v33 }
  0xb4   :  { %v132_v35 = vmul.f32 %v129_v34, %v91_v7 }
  0xb6   :  { %v134_v36 = vmul.f32 %v132_v35, %v132_v35 }
  0xb8   :  { %137 = vadd.xlane.f32.xlu0 %v134_v36 }
 0x123   :  { %v136_v45 = vpop.xlane.xlu0 %135 }
 0x124   :  { %v140_v46 = vmax.f32 %v136_v45, 1e-10  ;;  %v703_v45 = vld [vmem:[#allocation2 + $0x50] sm:$0xff] }
 0x125   :  { %401 = vmatpush.bf16.msra.mxu2 %v703_v45  ;;  %v714_v45 = vld [vmem:[%s918_s4 + $0x28] sm:$0xff] }
 0x126   :  { %733 = vrsqrt.f32 %v140_v46  ;;  %vm148_vm10 = vweird.f32 %v140_v46  ;;  %555 = vmatpush.bf16.msra.mxu3 %v714_v45 }
 0x12b   :  { %v138_v47 = vpop.xlane.xlu0 %137 }
 0x12c   :  { %v734_v48 = vpop.eup %733  ;;  %v141_v49 = vmax.f32 %v138_v47, 1e-10  ;;  %v701_v47 = vld [vmem:[#allocation2 + $0x40] sm:$0xff] }
 0x12d   :  { %v143_v50 = vmul.f32 %v734_v48, %v140_v46  ;;  %vm149_vm9 = vweird.f32 %v734_v48  ;;  %v702_v46 = vld [vmem:[#allocation2 + $0x48] sm:$0xff] }
 0x12e   :  { %735 = vrsqrt.f32 %v141_v49  ;;  %vm150_vm11 = vmor %vm148_vm10, %vm149_vm9  ;;  %vm158_vm13 = vweird.f32 %v141_v49  ;;  %402 = vmatpush.bf16.msra.mxu2 %v702_v46  ;;  %v713_v46 = vld [vmem:[%s918_s4 + $0x20] sm:$0xff] }
 0x12f   :  { %v144_v51 = vmul.f32 %v734_v48, %v143_v50  ;;  %556 = vmatpush.bf16.msra.mxu3 %v713_v46 }
 0x131   :  { %v145_v52 = vmul.f32 0.5, %v144_v51 }
 0x132   :  { %403 = vmatpush.bf16.msra.mxu2 %v701_v47  ;;  %v712_v47 = vld [vmem:[%s918_s4 + $0x18] sm:$0xff] }
 0x133   :  { %v146_v53 = vsub.f32 1.5, %v145_v52  ;;  %557 = vmatpush.bf16.msra.mxu3 %v712_v47 }
 0x134   :  { %v736_v54 = vpop.eup %735 }
 0x135   :  { %v153_v55 = vmul.f32 %v736_v54, %v141_v49  ;;  %v147_v56 = vmul.f32 %v734_v48, %v146_v53  ;;  %vm159_vm12 = vweird.f32 %v736_v54 }
 0x136   :  { %vm160_vm14 = vmor %vm158_vm13, %vm159_vm12 }
 0x137   :  { %v154_v57 = vmul.f32 %v736_v54, %v153_v55  ;;  %v151_v60 = vsel %vm150_vm11, %v734_v48, %v147_v56 }
 0x138   :  { %v163_v63 = vmul.f32 %v162_v61, %v151_v60 }
 0x139   :  { %v155_v58 = vmul.f32 0.5, %v154_v57 }
 0x13a   :  { %v165_v2 = vmul.f32 %v163_v63, %v860_v26 }
 0x13b   :  { %v156_v59 = vsub.f32 1.5, %v155_v58 }
 0x13d   :  { %v157_v62 = vmul.f32 %v736_v54, %v156_v59 }
 0x13f   :  { %v161_v0 = vsel %vm160_vm14, %v736_v54, %v157_v62 }
 0x140   :  { %v164_v1 = vmul.f32 %v162_v61, %v161_v0  ;;  %v320_v0 = vstv %s622_s17 }
 0x142   :  { %v166_v3 = vmul.f32 %v164_v1, %v132_v35 }
 0x144   :  { %v167_v4 = vpack.c.bf16 %v166_v3, %v165_v2 }
 0x146   :  { %245 = vmatmul.bf16.vlgmr.msra.gmra.mxu1 %v167_v4 }
 0x1c3   :  { %v246_v6 = vpop.f32.mrf.mxu1 }
 0x1c4   :  { %v247_v7 = vadd.f32 %v722_v5, %v246_v6 }
 0x1c6   :  { %v620_v8 = vmul.f32 -1.442695, %v247_v7 }
 0x1c8   :  { %737 = vpow2.f32 %v620_v8  ;;  %v723_v8 = vld [vmem:[%s916_s2 + $0x2] ss:$0 sm:$0xff] }
 0x1cb   :  { %v248_v9 = vpop.f32.mrf.mxu1 }
 0x1cc   :  { %v249_v10 = vadd.f32 %v722_v5, %v248_v9 }
 0x1ce   :  { %v738_v11 = vpop.eup %737  ;;  %v621_v12 = vmul.f32 -1.442695, %v249_v10 }
 0x1cf   :  { %v257_v13 = vadd.f32 1.0, %v738_v11 }
 0x1d0   :  { %739 = vpow2.f32 %v621_v12 }
 0x1d1   :  { %741 = vrcp.f32 %v257_v13  ;;  %v270_v19 = vand.u32 2147483648, %v257_v13  ;;  %v268_v21 = vand.u32 2147483647, %v257_v13  ;;  %vm264_vm0 = vweird.f32 %v257_v13 }
 0x1d3   :  { %v271_v24 = vor.u32 1.1754944e-38, %v270_v19  ;;  %vm269_vm2 = vcmp.eq.f32.partialorder %v268_v21, 8.507059e+37 }
 0x1d6   :  { %v740_v14 = vpop.eup %739 }
 0x1d7   :  { %v742_v15 = vpop.eup %741  ;;  %v258_v16 = vadd.f32 1.0, %v740_v14 }
 0x1d8   :  { %v260_v17 = vmul.f32 %v742_v15, %v257_v13  ;;  %vm265_vm15 = vweird.f32 %v742_v15 }
 0x1d9   :  { %743 = vrcp.f32 %v258_v16  ;;  %vm266_vm1 = vmor %vm264_vm0, %vm265_vm15  ;;  %v285_v30 = vand.u32 2147483648, %v258_v16  ;;  %v283_v32 = vand.u32 2147483647, %v258_v16  ;;  %vm279_vm4 = vweird.f32 %v258_v16 }
 0x1da   :  { %v261_v18 = vsub.f32 1.0, %v260_v17 }
 0x1db   :  { %v286_v35 = vor.u32 1.1754944e-38, %v285_v30  ;;  %vm284_vm6 = vcmp.eq.f32.partialorder %v283_v32, 8.507059e+37 }
 0x1dc   :  { %v262_v20 = vmul.f32 %v742_v15, %v261_v18 }
 0x1de   :  { %v263_v22 = vadd.f32 %v742_v15, %v262_v20 }
 0x1df   :  { %v744_v23 = vpop.eup %743 }
 0x1e0   :  { %v275_v25 = vmul.f32 %v744_v23, %v258_v16  ;;  %v267_v26 = vsel %vm266_vm1, %v742_v15, %v263_v22  ;;  %vm280_vm3 = vweird.f32 %v744_v23 }
 0x1e1   :  { %v272_v27 = vsel %vm269_vm2, %v271_v24, %v267_v26  ;;  %vm281_vm5 = vmor %vm279_vm4, %vm280_vm3 }
 0x1e2   :  { %v276_v28 = vsub.f32 1.0, %v275_v25  ;;  %v868_v29 = vmul.f32 %v272_v27, %v247_v7 }
 0x1e4   :  { %v277_v31 = vmul.f32 %v744_v23, %v276_v28  ;;  %v291_v33 = vmul.f32 %v868_v29, %v868_v29 }
 0x1e6   :  { %v278_v34 = vadd.f32 %v744_v23, %v277_v31  ;;  %293 = vadd.xlane.f32.xlu1 %v291_v33 }
 0x1e8   :  { %v282_v36 = vsel %vm281_vm5, %v744_v23, %v278_v34 }
 0x1e9   :  { %v287_v37 = vsel %vm284_vm6, %v286_v35, %v282_v36 }
 0x1ea   :  { %v290_v38 = vmul.f32 %v287_v37, %v249_v10 }
 0x1ec   :  { %v292_v39 = vmul.f32 %v290_v38, %v290_v38 }
 0x1ee   :  { %295 = vadd.xlane.f32.xlu1 %v292_v39 }
 0x259   :  { %v294_v48 = vpop.xlane.xlu1 %293 }
 0x25a   :  { %v298_v49 = vmax.f32 %v294_v48, 1e-10  ;;  %v711_v48 = vld [vmem:[%s918_s4 + $0x10] sm:$0xff] }
 0x25b   :  { %558 = vmatpush.bf16.msra.mxu3 %v711_v48 }
 0x25c   :  { %745 = vrsqrt.f32 %v298_v49  ;;  %vm306_vm8 = vweird.f32 %v298_v49 }
 0x261   :  { %v296_v50 = vpop.xlane.xlu1 %295 }
 0x262   :  { %v746_v51 = vpop.eup %745  ;;  %v299_v52 = vmax.f32 %v296_v50, 1e-10  ;;  %v709_v50 = vld [vmem:[%s918_s4] sm:$0xff] }
 0x263   :  { %v301_v53 = vmul.f32 %v746_v51, %v298_v49  ;;  %vm307_vm7 = vweird.f32 %v746_v51  ;;  %v710_v49 = vld [vmem:[%s918_s4 + $0x8] sm:$0xff] }
 0x264   :  { %747 = vrsqrt.f32 %v299_v52  ;;  %vm308_vm9 = vmor %vm306_vm8, %vm307_vm7  ;;  %vm316_vm11 = vweird.f32 %v299_v52  ;;  %559 = vmatpush.bf16.msra.mxu3 %v710_v49 }
 0x265   :  { %v302_v54 = vmul.f32 %v746_v51, %v301_v53 }
 0x267   :  { %v303_v55 = vmul.f32 0.5, %v302_v54 }
 0x268   :  { %560 = vmatpush.bf16.msra.mxu3 %v709_v50 }
 0x269   :  { %v304_v56 = vsub.f32 1.5, %v303_v55 }
 0x26a   :  { %v748_v57 = vpop.eup %747 }
 0x26b   :  { %v311_v58 = vmul.f32 %v748_v57, %v299_v52  ;;  %v305_v59 = vmul.f32 %v746_v51, %v304_v56  ;;  %vm317_vm10 = vweird.f32 %v748_v57 }
 0x26c   :  { %vm318_vm12 = vmor %vm316_vm11, %vm317_vm10  ;;  %vm567_vm11 = vcmask 31744  }
 0x26d   :  { %v312_v60 = vmul.f32 %v748_v57, %v311_v58  ;;  %v309_v63 = vsel %vm308_vm9, %v746_v51, %v305_v59 }
 0x26e   :  { %v321_v2 = vmul.f32 %v320_v0, %v309_v63 }
 0x26f   :  { %v313_v61 = vmul.f32 0.5, %v312_v60 }
 0x270   :  { %v323_v5 = vmul.f32 %v321_v2, %v868_v29 }
 0x271   :  { %v314_v62 = vsub.f32 1.5, %v313_v61 }
 0x273   :  { %v315_v1 = vmul.f32 %v748_v57, %v314_v62 }
 0x275   :  { %v319_v3 = vsel %vm318_vm12, %v748_v57, %v315_v1 }
 0x276   :  { %v322_v4 = vmul.f32 %v320_v0, %v319_v3  ;;  %v479_v3 = vstv %s658_s1 }
 0x278   :  { %v324_v6 = vmul.f32 %v322_v4, %v290_v38 }
 0x27a   :  { %v325_v7 = vpack.c.bf16 %v324_v6, %v323_v5 }
 0x27c   :  { %404 = vmatmul.bf16.vlgmr.msra.gmra.mxu2 %v325_v7 }
 0x2ff   :  { %v405_v9 = vpop.f32.mrf.mxu2 }
 0x300   :  { %v406_v10 = vadd.f32 %v723_v8, %v405_v9 }
 0x302   :  { %v656_v11 = vmul.f32 -1.442695, %v406_v10 }
 0x304   :  { %749 = vpow2.f32 %v656_v11  ;;  %v724_v11 = vld [vmem:[%s919_s5] ss:$0 sm:$0xff] }
 0x307   :  { %v407_v12 = vpop.f32.mrf.mxu2 }
 0x308   :  { %v408_v13 = vadd.f32 %v723_v8, %v407_v12 }
 0x30a   :  { %v750_v14 = vpop.eup %749  ;;  %v657_v15 = vmul.f32 -1.442695, %v408_v13 }
 0x30b   :  { %v416_v16 = vadd.f32 1.0, %v750_v14 }
 0x30c   :  { %751 = vpow2.f32 %v657_v15 }
 0x30d   :  { %753 = vrcp.f32 %v416_v16  ;;  %v429_v22 = vand.u32 2147483648, %v416_v16  ;;  %v427_v24 = vand.u32 2147483647, %v416_v16  ;;  %vm423_vm14 = vweird.f32 %v416_v16 }
 0x30f   :  { %v430_v27 = vor.u32 1.1754944e-38, %v429_v22  ;;  %vm428_vm0 = vcmp.eq.f32.partialorder %v427_v24, 8.507059e+37 }
 0x312   :  { %v752_v17 = vpop.eup %751 }
 0x313   :  { %v754_v18 = vpop.eup %753  ;;  %v417_v19 = vadd.f32 1.0, %v752_v17 }
 0x314   :  { %v419_v20 = vmul.f32 %v754_v18, %v416_v16  ;;  %vm424_vm13 = vweird.f32 %v754_v18 }
 0x315   :  { %755 = vrcp.f32 %v417_v19  ;;  %vm425_vm15 = vmor %vm423_vm14, %vm424_vm13  ;;  %v444_v33 = vand.u32 2147483648, %v417_v19  ;;  %v442_v35 = vand.u32 2147483647, %v417_v19  ;;  %vm438_vm2 = vweird.f32 %v417_v19 }
 0x316   :  { %v420_v21 = vsub.f32 1.0, %v419_v20 }
 0x317   :  { %v445_v38 = vor.u32 1.1754944e-38, %v444_v33  ;;  %vm443_vm4 = vcmp.eq.f32.partialorder %v442_v35, 8.507059e+37 }
 0x318   :  { %v421_v23 = vmul.f32 %v754_v18, %v420_v21 }
 0x31a   :  { %v422_v25 = vadd.f32 %v754_v18, %v421_v23 }
 0x31b   :  { %v756_v26 = vpop.eup %755 }
 0x31c   :  { %v434_v28 = vmul.f32 %v756_v26, %v417_v19  ;;  %v426_v29 = vsel %vm425_vm15, %v754_v18, %v422_v25  ;;  %vm439_vm1 = vweird.f32 %v756_v26 }
 0x31d   :  { %v431_v30 = vsel %vm428_vm0, %v430_v27, %v426_v29  ;;  %vm440_vm3 = vmor %vm438_vm2, %vm439_vm1 }
 0x31e   :  { %v435_v31 = vsub.f32 1.0, %v434_v28  ;;  %v876_v32 = vmul.f32 %v431_v30, %v406_v10 }
 0x320   :  { %v436_v34 = vmul.f32 %v756_v26, %v435_v31  ;;  %v450_v36 = vmul.f32 %v876_v32, %v876_v32 }
 0x322   :  { %v437_v37 = vadd.f32 %v756_v26, %v436_v34  ;;  %452 = vadd.xlane.f32.xlu2 %v450_v36 }
 0x324   :  { %v441_v39 = vsel %vm440_vm3, %v756_v26, %v437_v37 }
 0x325   :  { %v446_v40 = vsel %vm443_vm4, %v445_v38, %v441_v39 }
 0x326   :  { %v449_v41 = vmul.f32 %v446_v40, %v408_v13 }
 0x328   :  { %v451_v42 = vmul.f32 %v449_v41, %v449_v41 }
 0x32a   :  { %454 = vadd.xlane.f32.xlu2 %v451_v42 }
 0x395   :  { %v453_v51 = vpop.xlane.xlu2 %452 }
 0x396   :  { %v457_v52 = vmax.f32 %v453_v51, 1e-10 }
 0x398   :  { %757 = vrsqrt.f32 %v457_v52  ;;  %vm465_vm6 = vweird.f32 %v457_v52 }
 0x39d   :  { %v455_v53 = vpop.xlane.xlu2 %454 }
 0x39e   :  { %v758_v54 = vpop.eup %757  ;;  %v458_v55 = vmax.f32 %v455_v53, 1e-10 }
 0x39f   :  { %v460_v56 = vmul.f32 %v758_v54, %v457_v52  ;;  %vm466_vm5 = vweird.f32 %v758_v54 }
 0x3a0   :  { %759 = vrsqrt.f32 %v458_v55  ;;  %vm467_vm7 = vmor %vm465_vm6, %vm466_vm5  ;;  %vm475_vm9 = vweird.f32 %v458_v55 }
 0x3a1   :  { %v461_v57 = vmul.f32 %v758_v54, %v460_v56 }
 0x3a3   :  { %v462_v58 = vmul.f32 0.5, %v461_v57 }
 0x3a5   :  { %v463_v59 = vsub.f32 1.5, %v462_v58 }
 0x3a6   :  { %v760_v60 = vpop.eup %759 }
 0x3a7   :  { %v470_v61 = vmul.f32 %v760_v60, %v458_v55  ;;  %v464_v62 = vmul.f32 %v758_v54, %v463_v59  ;;  %vm476_vm8 = vweird.f32 %v760_v60 }
 0x3a8   :  { %vm477_vm10 = vmor %vm475_vm9, %vm476_vm8 }
 0x3a9   :  { %v471_v63 = vmul.f32 %v760_v60, %v470_v61  ;;  %v468_v2 = vsel %vm467_vm7, %v758_v54, %v464_v62 }
 0x3aa   :  { %v480_v5 = vmul.f32 %v479_v3, %v468_v2 }
 0x3ab   :  { %v472_v0 = vmul.f32 0.5, %v471_v63 }
 0x3ac   :  { %v482_v8 = vmul.f32 %v480_v5, %v876_v32 }
 0x3ad   :  { %v473_v1 = vsub.f32 1.5, %v472_v0 }
 0x3af   :  { %v474_v4 = vmul.f32 %v760_v60, %v473_v1 }
 0x3b1   :  { %v478_v6 = vsel %vm477_vm10, %v760_v60, %v474_v4 }
 0x3b2   :  { %v481_v7 = vmul.f32 %v479_v3, %v478_v6 }
 0x3b4   :  { %v483_v9 = vmul.f32 %v481_v7, %v449_v41 }
 0x3b6   :  { %v484_v10 = vpack.c.bf16 %v483_v9, %v482_v8 }
 0x3b8   :  { %561 = vmatmul.bf16.vlgmr.msra.gmra.mxu3 %v484_v10 }
 0x43b   :  { %v562_v12 = vpop.f32.mrf.mxu3 }
 0x43c   :  { %v563_v13 = vadd.f32 %v724_v11, %v562_v12 }
 0x43e   :  { %568 = vst.msk [vmem:[%s921_s7] sm:$0xff] %vm567_vm11, %v563_v13 }
 0x443   :  { %v564_v14 = vpop.f32.mrf.mxu3 }
 0x444   :  { %v565_v15 = vadd.f32 %v724_v11, %v564_v14 }
 0x446   :  { %569 = vst.msk [vmem:[%s921_s7 + $0x8] sm:$0xff] %vm567_vm11, %v565_v15 }
 0x447   :  { %574 = vsyncpa [#allocation3], 1 }
 0x448   :  { %575 = vsyncpa [#allocation4], 1 }

</bundles_post_ra>
